<compile_context>
chip_gen: v7x
topology: tpu7x:2x2x1
jax: 0.10.0
libtpu: 0.0.40
codegen_flags: <defaults>
</compile_context>

<pallas_src>
import jax
import jax.numpy as jnp
from jax import lax
from jax.experimental import pallas as pl
from jax.experimental.pallas import tpu as pltpu

POOL_SIZE = 3  # TODO(synk): generalize the 3-tap separable window for other pool sizes.


def _pick_d_tile(D, plane_bytes, budget_bytes=2 << 20):
    """Largest divisor of D whose (TD, H, W*C) block stays under `budget_bytes`."""
    best = 1
    for td in range(1, D + 1):
        if D % td == 0 and td * plane_bytes <= budget_bytes:
            best = td
    return best


def pooling(x, *, d_tile=None, vmem_limit_bytes=None):
    """x: (B, D, H, W, C). Returns AvgPool3d(3, stride=1, pad=1, count_include_pad=False)(x) - x."""
    B, D, H, W, C = x.shape
    WC = W * C
    itemsize = jnp.dtype(x.dtype).itemsize
    if d_tile is None:
        # Block budget sized for v7x (64 MiB phys / 32 MiB scoped VMEM); f32 accumulation.
        d_tile = _pick_d_tile(D, H * WC * max(itemsize, 4))
    assert D % d_tile == 0, "d_tile must divide D"
    TD = d_tile
    nt = D // TD

    # Lane-dense packing: (..., W, C) -> (..., W*C).  Trivial row-major collapse.
    x_packed = x.reshape(B, D, H, WC)

    # Precomputed reciprocal of the D*H valid-element count (position only, tiny).
    d_idx = jnp.arange(D)
    h_idx = jnp.arange(H)
    cd = 3.0 - (d_idx == 0).astype(jnp.float32) - (d_idx == D - 1).astype(jnp.float32)
    ch = 3.0 - (h_idx == 0).astype(jnp.float32) - (h_idx == H - 1).astype(jnp.float32)
    inv_dh = (1.0 / cd)[:, None, None] * (1.0 / ch)[None, :, None]  # (D, H, 1) f32

    def kernel(inv_dh_ref, prev_ref, cen_ref, nxt_ref, o_ref):
        t = pl.program_id(1)
        num_t = pl.num_programs(1)

        xc = cen_ref[...].astype(jnp.float32)                       # (TD, H, WC)
        # Halo planes, zeroed when they fall outside the global D extent.
        w_prev = jnp.where(t == 0, 0.0, 1.0)
        w_next = jnp.where(t == num_t - 1, 0.0, 1.0)
        x_prev = prev_ref[...].astype(jnp.float32) * w_prev         # (1, H, WC)
        x_next = nxt_ref[...].astype(jnp.float32) * w_next          # (1, H, WC)

        # --- D-axis 3-tap sum (zero pad): s[d] = x[d-1] + x[d] + x[d+1] ---
        full = jnp.concatenate([x_prev, xc, x_next], axis=0)        # (TD+2, H, WC)
        s = full[:TD] + full[1:TD + 1] + full[2:TD + 2]             # (TD, H, WC)

        # --- H-axis 3-tap sum via sublane roll (XLU) + boundary mask ---
        hi = lax.broadcasted_iota(jnp.int32, (1, H, 1), 1)
        h_prev = pltpu.roll(s, shift=1, axis=1)        # s[h-1]
        h_next = pltpu.roll(s, shift=H - 1, axis=1)    # s[h+1] (positive-rotation form)
        s = s + jnp.where(hi >= 1, h_prev, 0.0) + jnp.where(hi < H - 1, h_next, 0.0)

        # --- W-axis 3-tap sum via lane roll by C on the packed layout + mask ---
        li = lax.broadcasted_iota(jnp.int32, (1, 1, WC), 2)
        w_prev_v = pltpu.roll(s, shift=C, axis=2)        # value at w-1
        w_next_v = pltpu.roll(s, shift=WC - C, axis=2)   # value at w+1
        s = s + jnp.where(li >= C, w_prev_v, 0.0) + jnp.where(li < WC - C, w_next_v, 0.0)

        # --- count_include_pad=False: multiply by reciprocal valid counts ---
        cw = 3.0 - (li < C).astype(jnp.float32) - (li >= WC - C).astype(jnp.float32)
        inv_w = 1.0 / cw                                             # tiny (1, 1, WC)
        inv_dh_v = inv_dh_ref[...]                                   # (TD, H, 1)

        o_ref[...] = (s * inv_dh_v * inv_w - xc).astype(o_ref.dtype)

    nbytes = x.size * itemsize
    out = pl.pallas_call(
        kernel,
        out_shape=jax.ShapeDtypeStruct((B, D, H, WC), x.dtype),
        grid=(B, nt),
        in_specs=[
            # tiny positional reciprocal-count factor, blocked along D
            pl.BlockSpec((TD, H, 1), lambda b, t: (t, 0, 0)),
            # previous-plane halo (block size 1 along D => element offset; masked at t==0)
            pl.BlockSpec((None, 1, H, WC),
                         lambda b, t: (b, jnp.maximum(t * TD - 1, 0), 0, 0)),
            # center TD planes
            pl.BlockSpec((None, TD, H, WC), lambda b, t: (b, t, 0, 0)),
            # next-plane halo (masked at the last tile)
            pl.BlockSpec((None, 1, H, WC),
                         lambda b, t: (b, jnp.minimum(t * TD + TD, D - 1), 0, 0)),
        ],
        out_specs=pl.BlockSpec((None, TD, H, WC), lambda b, t: (b, t, 0, 0)),
        compiler_params=pltpu.CompilerParams(
            dimension_semantics=("parallel", "parallel"),
            vmem_limit_bytes=vmem_limit_bytes,
        ),
        cost_estimate=pl.CostEstimate(
            flops=8 * x.size,
            transcendentals=0,
            bytes_accessed=int(2 * nbytes + 2 * nbytes // max(TD, 1)),
        ),
    )(inv_dh, x_packed, x_packed, x_packed)
    return out.reshape(B, D, H, W, C)


def pooling_ref(x):
    """Pure-JAX reference: AvgPool3d(3, stride=1, pad=1, count_include_pad=False) - x."""
    window = (1, POOL_SIZE, POOL_SIZE, POOL_SIZE, 1)
    strides = (1, 1, 1, 1, 1)
    pad = [(0, 0), (1, 1), (1, 1), (1, 1), (0, 0)]
    xf = x.astype(jnp.float32)
    s = lax.reduce_window(xf, 0.0, lax.add, window, strides, pad)
    cnt = lax.reduce_window(jnp.ones_like(xf), 0.0, lax.add, window, strides, pad)
    return (s / cnt - xf).astype(x.dtype)


if __name__ == "__main__":
    key = jax.random.PRNGKey(0)
    # W*C = 128 -> lane-dense blocks; H = 8 -> sublane aligned.
    B, D, H, W, C = 2, 8, 8, 16, 8
    x = jax.random.normal(key, (B, D, H, W, C), dtype=jnp.float32)

    ref = pooling_ref(x)
    # Exercise single-tile and multi-tile (D-halo) paths.
    for td in (None, 4, 2):
        out = jax.block_until_ready(pooling(x, d_tile=td))
        assert out.shape == x.shape and out.dtype == x.dtype
        err = jnp.max(jnp.abs(out - ref))
        assert jnp.allclose(out, ref, atol=1e-5, rtol=1e-5), (
            f"d_tile={td}: max abs err {err}")
    print("KERNEL_OK")
</pallas_src>

<mosaic_0001>
module attributes {stable_mosaic.version = 11 : i64} {
  func.func @kernel(%arg0: i32, %arg1: i32, %arg2: memref<8x8x1xf32, #tpu.memory_space<vmem>>, %arg3: memref<1x1x8x128xf32, #tpu.memory_space<vmem>>, %arg4: memref<1x8x8x128xf32, #tpu.memory_space<vmem>>, %arg5: memref<1x1x8x128xf32, #tpu.memory_space<vmem>>, %arg6: memref<1x8x8x128xf32, #tpu.memory_space<vmem>>) attributes {dimension_semantics = [#tpu.dimension_semantics<parallel>, #tpu.dimension_semantics<parallel>], iteration_bounds = array<i64: 2, 1>, scalar_prefetch = 0 : i64, scratch_operands = 0 : i64, tpu.core_type = #tpu.core_type<tc>, window_params = [{transform_indices = @transform_0, window_bounds = array<i64: 8, 8, 1>}, {transform_indices = @transform_1, window_bounds = array<i64: 1, 1, 8, 128>}, {transform_indices = @transform_2, window_bounds = array<i64: 1, 8, 8, 128>}, {transform_indices = @transform_3, window_bounds = array<i64: 1, 1, 8, 128>}, {transform_indices = @transform_4, window_bounds = array<i64: 1, 8, 8, 128>}]} {
    %c0 = arith.constant 0 : index
    %c0_0 = arith.constant 0 : index
    %c0_1 = arith.constant 0 : index
    %c0_2 = arith.constant 0 : index
    %0 = vector.load %arg4[%c0, %c0_0, %c0_1, %c0_2] : memref<1x8x8x128xf32, #tpu.memory_space<vmem>>, vector<1x8x8x128xf32>
    %1 = vector.shape_cast %0 : vector<1x8x8x128xf32> to vector<8x8x128xf32>
    %c0_i32 = arith.constant 0 : i32
    %2 = arith.cmpi eq, %arg1, %c0_i32 : i32
    %cst = arith.constant 0.000000e+00 : f32
    %cst_3 = arith.constant 1.000000e+00 : f32
    %3 = arith.select %2, %cst, %cst_3 : f32
    %c0_i32_4 = arith.constant 0 : i32
    %4 = arith.cmpi eq, %arg1, %c0_i32_4 : i32
    %cst_5 = arith.constant 0.000000e+00 : f32
    %cst_6 = arith.constant 1.000000e+00 : f32
    %5 = arith.select %4, %cst_5, %cst_6 : f32
    %c0_7 = arith.constant 0 : index
    %c0_8 = arith.constant 0 : index
    %c0_9 = arith.constant 0 : index
    %c0_10 = arith.constant 0 : index
    %6 = vector.load %arg3[%c0_7, %c0_8, %c0_9, %c0_10] : memref<1x1x8x128xf32, #tpu.memory_space<vmem>>, vector<1x1x8x128xf32>
    %7 = vector.shape_cast %6 : vector<1x1x8x128xf32> to vector<1x8x128xf32>
    %8 = vector.broadcast %3 : f32 to vector<1x8x128xf32>
    %9 = arith.mulf %7, %8 : vector<1x8x128xf32>
    %c0_11 = arith.constant 0 : index
    %c0_12 = arith.constant 0 : index
    %c0_13 = arith.constant 0 : index
    %c0_14 = arith.constant 0 : index
    %10 = vector.load %arg5[%c0_11, %c0_12, %c0_13, %c0_14] : memref<1x1x8x128xf32, #tpu.memory_space<vmem>>, vector<1x1x8x128xf32>
    %11 = vector.shape_cast %10 : vector<1x1x8x128xf32> to vector<1x8x128xf32>
    %12 = vector.broadcast %5 : f32 to vector<1x8x128xf32>
    %13 = arith.mulf %11, %12 : vector<1x8x128xf32>
    %14 = tpu.concatenate %9, %1, %13 in 0 : vector<1x8x128xf32>, vector<8x8x128xf32>, vector<1x8x128xf32> -> vector<10x8x128xf32>
    %15 = vector.extract_strided_slice %14 {offsets = [0, 0, 0], sizes = [8, 8, 128], strides = [1, 1, 1]} : vector<10x8x128xf32> to vector<8x8x128xf32>
    %16 = vector.extract_strided_slice %14 {offsets = [1, 0, 0], sizes = [8, 8, 128], strides = [1, 1, 1]} : vector<10x8x128xf32> to vector<8x8x128xf32>
    %17 = arith.addf %15, %16 : vector<8x8x128xf32>
    %18 = vector.extract_strided_slice %14 {offsets = [2, 0, 0], sizes = [8, 8, 128], strides = [1, 1, 1]} : vector<10x8x128xf32> to vector<8x8x128xf32>
    %19 = arith.addf %17, %18 : vector<8x8x128xf32>
    %20 = tpu.iota {dimensions = array<i32: 1>} : vector<1x8x1xi32>
    %c1_i32 = arith.constant 1 : i32
    %21 = tpu.dynamic_rotate %19 by %c1_i32 dim 1 : vector<8x8x128xf32>, i32 -> vector<8x8x128xf32>
    %c7_i32 = arith.constant 7 : i32
    %22 = tpu.dynamic_rotate %19 by %c7_i32 dim 1 : vector<8x8x128xf32>, i32 -> vector<8x8x128xf32>
    %c1_i32_15 = arith.constant 1 : i32
    %23 = vector.broadcast %c1_i32_15 : i32 to vector<1x8x1xi32>
    %24 = arith.cmpi sge, %20, %23 : vector<1x8x1xi32>
    %cst_16 = arith.constant 0.000000e+00 : f32
    %25 = vector.shape_cast %24 : vector<1x8x1xi1> to vector<1x8x1xi1>
    %26 = vector.broadcast %25 : vector<1x8x1xi1> to vector<8x8x128xi1>
    %27 = vector.broadcast %cst_16 : f32 to vector<8x8x128xf32>
    %28 = arith.select %26, %21, %27 : vector<8x8x128xi1>, vector<8x8x128xf32>
    %29 = arith.addf %19, %28 : vector<8x8x128xf32>
    %c7_i32_17 = arith.constant 7 : i32
    %30 = vector.broadcast %c7_i32_17 : i32 to vector<1x8x1xi32>
    %31 = arith.cmpi slt, %20, %30 : vector<1x8x1xi32>
    %cst_18 = arith.constant 0.000000e+00 : f32
    %32 = vector.shape_cast %31 : vector<1x8x1xi1> to vector<1x8x1xi1>
    %33 = vector.broadcast %32 : vector<1x8x1xi1> to vector<8x8x128xi1>
    %34 = vector.broadcast %cst_18 : f32 to vector<8x8x128xf32>
    %35 = arith.select %33, %22, %34 : vector<8x8x128xi1>, vector<8x8x128xf32>
    %36 = arith.addf %29, %35 : vector<8x8x128xf32>
    %37 = tpu.iota {dimensions = array<i32: 2>} : vector<1x1x128xi32>
    %c8_i32 = arith.constant 8 : i32
    %38 = tpu.dynamic_rotate %36 by %c8_i32 dim 2 : vector<8x8x128xf32>, i32 -> vector<8x8x128xf32>
    %c120_i32 = arith.constant 120 : i32
    %39 = tpu.dynamic_rotate %36 by %c120_i32 dim 2 : vector<8x8x128xf32>, i32 -> vector<8x8x128xf32>
    %c8_i32_19 = arith.constant 8 : i32
    %40 = vector.broadcast %c8_i32_19 : i32 to vector<1x1x128xi32>
    %41 = arith.cmpi sge, %37, %40 : vector<1x1x128xi32>
    %cst_20 = arith.constant 0.000000e+00 : f32
    %42 = vector.shape_cast %41 : vector<1x1x128xi1> to vector<1x1x128xi1>
    %43 = vector.broadcast %42 : vector<1x1x128xi1> to vector<8x8x128xi1>
    %44 = vector.broadcast %cst_20 : f32 to vector<8x8x128xf32>
    %45 = arith.select %43, %38, %44 : vector<8x8x128xi1>, vector<8x8x128xf32>
    %46 = arith.addf %36, %45 : vector<8x8x128xf32>
    %c120_i32_21 = arith.constant 120 : i32
    %47 = vector.broadcast %c120_i32_21 : i32 to vector<1x1x128xi32>
    %48 = arith.cmpi slt, %37, %47 : vector<1x1x128xi32>
    %cst_22 = arith.constant 0.000000e+00 : f32
    %49 = vector.shape_cast %48 : vector<1x1x128xi1> to vector<1x1x128xi1>
    %50 = vector.broadcast %49 : vector<1x1x128xi1> to vector<8x8x128xi1>
    %51 = vector.broadcast %cst_22 : f32 to vector<8x8x128xf32>
    %52 = arith.select %50, %39, %51 : vector<8x8x128xi1>, vector<8x8x128xf32>
    %53 = arith.addf %46, %52 : vector<8x8x128xf32>
    %c8_i32_23 = arith.constant 8 : i32
    %54 = vector.broadcast %c8_i32_23 : i32 to vector<1x1x128xi32>
    %55 = arith.cmpi slt, %37, %54 : vector<1x1x128xi32>
    %56 = arith.extui %55 : vector<1x1x128xi1> to vector<1x1x128xi32>
    %57 = arith.sitofp %56 : vector<1x1x128xi32> to vector<1x1x128xf32>
    %cst_24 = arith.constant 3.000000e+00 : f32
    %58 = vector.broadcast %cst_24 : f32 to vector<1x1x128xf32>
    %59 = arith.subf %58, %57 : vector<1x1x128xf32>
    %c120_i32_25 = arith.constant 120 : i32
    %60 = vector.broadcast %c120_i32_25 : i32 to vector<1x1x128xi32>
    %61 = arith.cmpi sge, %37, %60 : vector<1x1x128xi32>
    %62 = arith.extui %61 : vector<1x1x128xi1> to vector<1x1x128xi32>
    %63 = arith.sitofp %62 : vector<1x1x128xi32> to vector<1x1x128xf32>
    %64 = arith.subf %59, %63 : vector<1x1x128xf32>
    %cst_26 = arith.constant 1.000000e+00 : f32
    %65 = vector.broadcast %cst_26 : f32 to vector<1x1x128xf32>
    %66 = arith.divf %65, %64 : vector<1x1x128xf32>
    %c0_27 = arith.constant 0 : index
    %c0_28 = arith.constant 0 : index
    %c0_29 = arith.constant 0 : index
    %67 = vector.load %arg2[%c0_27, %c0_28, %c0_29] : memref<8x8x1xf32, #tpu.memory_space<vmem>>, vector<8x8x1xf32>
    %68 = vector.broadcast %67 : vector<8x8x1xf32> to vector<8x8x128xf32>
    %69 = arith.mulf %53, %68 : vector<8x8x128xf32>
    %70 = vector.broadcast %66 : vector<1x1x128xf32> to vector<8x8x128xf32>
    %71 = arith.mulf %69, %70 : vector<8x8x128xf32>
    %72 = arith.subf %71, %1 : vector<8x8x128xf32>
    %c0_30 = arith.constant 0 : index
    %c0_31 = arith.constant 0 : index
    %c0_32 = arith.constant 0 : index
    %c0_33 = arith.constant 0 : index
    %73 = vector.load %arg6[%c0_30, %c0_31, %c0_32, %c0_33] : memref<1x8x8x128xf32, #tpu.memory_space<vmem>>, vector<1x8x8x128xf32>
    %74 = vector.shape_cast %73 : vector<1x8x8x128xf32> to vector<8x8x128xf32>
    %75 = vector.shape_cast %72 : vector<8x8x128xf32> to vector<1x8x8x128xf32>
    tpu.vector_store %arg6[%c0_30, %c0_31, %c0_32, %c0_33], %75 {strides = array<i32>} : memref<1x8x8x128xf32, #tpu.memory_space<vmem>>, vector<1x8x8x128xf32>,
    return
  }
  func.func @transform_0(%arg0: i32, %arg1: i32) -> (i32, i32, i32) {
    %c0_i32 = arith.constant 0 : i32
    %c0_i32_0 = arith.constant 0 : i32
    %c0_i32_1 = arith.constant 0 : i32
    return %arg1, %c0_i32, %c0_i32_0 : i32, i32, i32
  }
  func.func @transform_1(%arg0: i32, %arg1: i32) -> (i32, i32, i32, i32) {
    %c8_i32 = arith.constant 8 : i32
    %0 = arith.muli %arg1, %c8_i32 : i32
    %c1_i32 = arith.constant 1 : i32
    %1 = arith.subi %0, %c1_i32 : i32
    %c0_i32 = arith.constant 0 : i32
    %2 = arith.maxsi %1, %c0_i32 : i32
    %c0_i32_0 = arith.constant 0 : i32
    %c0_i32_1 = arith.constant 0 : i32
    %c0_i32_2 = arith.constant 0 : i32
    return %arg0, %2, %c0_i32_0, %c0_i32_1 : i32, i32, i32, i32
  }
  func.func @transform_2(%arg0: i32, %arg1: i32) -> (i32, i32, i32, i32) {
    %c0_i32 = arith.constant 0 : i32
    %c0_i32_0 = arith.constant 0 : i32
    %c0_i32_1 = arith.constant 0 : i32
    return %arg0, %arg1, %c0_i32, %c0_i32_0 : i32, i32, i32, i32
  }
  func.func @transform_3(%arg0: i32, %arg1: i32) -> (i32, i32, i32, i32) {
    %c8_i32 = arith.constant 8 : i32
    %0 = arith.muli %arg1, %c8_i32 : i32
    %c8_i32_0 = arith.constant 8 : i32
    %1 = arith.addi %0, %c8_i32_0 : i32
    %c7_i32 = arith.constant 7 : i32
    %2 = arith.minsi %1, %c7_i32 : i32
    %c0_i32 = arith.constant 0 : i32
    %c0_i32_1 = arith.constant 0 : i32
    %c0_i32_2 = arith.constant 0 : i32
    return %arg0, %2, %c0_i32, %c0_i32_1 : i32, i32, i32, i32
  }
  func.func @transform_4(%arg0: i32, %arg1: i32) -> (i32, i32, i32, i32) {
    %c0_i32 = arith.constant 0 : i32
    %c0_i32_0 = arith.constant 0 : i32
    %c0_i32_1 = arith.constant 0 : i32
    return %arg0, %arg1, %c0_i32, %c0_i32_0 : i32, i32, i32, i32
  }
}

</mosaic_0001>

<bundles_post_ra>
// kernel: tpu_custom_call.1
= control target key start
LH: loop header
LB: loop body
LE: loop exit
PB: predicated region body
PF: predicated region fallthrough
CT: control target
= control target key end

     0   :  { %s1605_s0 = inlined_call_operand.vmem [shape: f32[8,8,1], index: 0, kind: input, shape index: {}]   ;;  %s1606_s1 = inlined_call_operand.hbm [shape: f32[2,8,8,128], index: 1, kind: input, shape index: {}]   ;;  %s1607_s2 = inlined_call_operand.hbm [shape: f32[2,8,8,128], index: 2, kind: input, shape index: {}]   ;;  %s1608_s3 = inlined_call_operand.hbm [shape: f32[2,8,8,128], index: 3, kind: input, shape index: {}]   ;;  %s1609_s4 = inlined_call_operand.hbm [shape: f32[2,8,8,128], index: 4, kind: output, shape index: {}]  }
   0x1   :  { %1617 = sst [smem:[#allocation16_spill]] %s1607_s2 }
   0x2   :  { %9 = vsyncpa [#allocation3], 0 }
   0x3   :  { %11 = vsyncpa [#allocation3 + $0x1], 0 }
   0x4   :  { %12 = vsyncpa [#allocation6], 0 }
   0x5   :  { %14 = vsyncpa [#allocation6 + $0x1], 0 }
   0x6   :  { %15 = vsyncpa [#allocation4], 0 }
   0x7   :  { %17 = vsyncpa [#allocation4 + $0x1], 0  ;;  %s1112_s15 = smov 0   ;;  %s1114_s16 = smov 0  }
   0x8   :  { %s1116_s17 = smov 0   ;;  %s1118_s18 = smov 0  }
   0x9   :  { %s1120_s19 = smov 0   ;;  %s1122_s20 = smov 0  }
   0xa LB: > { %1618 = sst [smem:[#allocation12_spill]] %s1062_s17  ;;  %s1143_s21 = sadd.s32 4294967295, %s1074_s20   ;;  %s1074_s20 = sphi %s1122_s20, %s23_s20   ;;  %s1070_s19 = sphi %s1120_s19, %s1640_s19   ;;  %s1066_s18 = sphi %s1118_s18, %s1639_s18   ;;  %s1062_s17 = sphi %s1116_s17, %s1638_s17   ;;  %s1058_s16 = sphi %s1114_s16, %s1642_s16   ;;  %s1054_s15 = sphi %s1112_s15, %s1641_s15  }
   0xb   : > { %1619 = sst [smem:[#allocation13_spill]] %s1070_s19  ;;  %s784_s22 = sadd.s32 4294967294, %s1074_s20  }
   0xc   : > { %s35_s23 = sadd.s32 1, %s1070_s19  ;;  %s78_s24 = sadd.s32 1, %s1062_s17 }
   0xd   : > { %p37_p0 = scmp.ge.s32.totalorder %s35_s23, 2  ;;  %p85_p1 = scmp.ne.s32.totalorder %s1062_s17, %s1058_s16 }
   0xe   : > { %p86_p2 = scmp.eq.s32.totalorder %s1074_s20, 0  ;;  %p91_p3 = scmp.ne.s32.totalorder %s1058_s16, %s1054_s15 }
   0xf   : > { %s1644_s23 = smov (%p37_p0, %s35_s23), 0  ;;  %p92_p5 = scmp.eq.s32.totalorder %s1143_s21, 0 }
  0x10   : > { %1620 = sst [smem:[#allocation14_spill]] %s1644_s23  ;;  %p1155_p4 = por %p86_p2, %p85_p1 }
  0x11   : > { %s73_s26 = ssub.s32 %s1070_s19, %s1644_s23  ;;  %p181_p6 = scmp.eq.s32.totalorder %s1143_s21, 1 }
  0x12   : > { %p76_p7 = scmp.eq.s32.totalorder %s73_s26, 0  ;;  %p1163_p8 = por %p92_p5, %p91_p3 }
  0x13   : > { %p1167_p9 = por %p181_p6, %p85_p1  ;;  %p187_p10 = scmp.eq.s32.totalorder %s784_s22, 1 }
  0x14   : > { %s1622_s27 = scalar_select %p1163_p8, 1, 0 }
  0x15   : > { %s1623_s28 = scalar_select %p1167_p9, 1, 0 }
  0x16   : > { %s1172_s29 = scalar_select %p76_p7, %s1062_s17, %s78_s24  }
  0x17   : > { %p1174_p11 = por %p187_p10, %p91_p3  ;;  %p837_p13 = scmp.lt.s32.totalorder %s1074_s20, 2 }
  0x18   : > { %1624 = sst [smem:[#allocation15_spill]] %s1172_s29  ;;  %s1181_s5 = sand.u32 1, %s1062_s17  }
  0x19   : > { %s1625_s30 = scalar_select %p1174_p11, 1, 0 }
  0x1a   : > { %s1184_s6 = sshll.u32 %s1070_s19, 10  ;;  %s240_s7 = sand.u32 1, %s1074_s20  }
  0x1b   : > { %p1189_p0 = pnand %p837_p13, %p1155_p4  ;;  %s791_s9 = sshll.u32 %s1181_s5, 6 }
  0x1c   : > { %s1627_s2 = sld [smem:[#allocation16_spill]]  ;;  %s244_s13 = scalar_lea.vmem [#allocation5], %s791_s9 }
  0x1d   : > { %s1626_s8 = scalar_select %p1189_p0, 1, 0 }
  0x1e   : > { %s253_s14 = sshll.u32 %s244_s13, 4  ;;  %s1202_s22 = scalar_lea.sflag [#allocation6], %s240_s7  ;;  %s1200_s14 = int_to_ptr.vmem [resolvable:$true] %s253_s14 }
  0x1f   : > { %p1208_p2 = pneg %p1189_p0 }
  0x22   : > { %s1198_s12 = scalar_lea.hbm %s1627_s2, %s1184_s6  ;;  %s903_s9 = scalar_lea.hbm %s1627_s2, 2048 }
  0x23   : > { %s898_s24 = scalar_lea.hbm %s1198_s12, 1024  ;;  %p904_p5 = scmp.lt.u32.totalorder %s1198_s12, %s1627_s2 }
  0x24   : > { %p899_p1 = scmp.ne.s32.totalorder %s1198_s12, %s898_s24  ;;  %p905_p6 = scmp.lt.u32.totalorder %s903_s9, %s898_s24 }
  0x25   : > { %p907_p10 = scmp.lt.u32.totalorder %s898_s24, %s1198_s12 }
  0x26   : > { %p901_p3 = pnand %p1208_p2, %p899_p1  ;;  %p906_p7 = por %p905_p6, %p904_p5 }
  0x28   : > { %p902_p4 = pneg %p901_p3  ;;  %p908_p13 = por %p907_p10, %p906_p7 }
  0x2a   : > { %p909_p12 = pnand %p908_p13, %p902_p4 }
  0x2c   : > { %912 = shalt.err (!%p909_p12)
}
  0x2d   : > { %s913_s7 = scalar_lea.vmem %s1200_s14, 1024  ;;  %s1076_s26 = smov [#allocation5]  }
  0x2e   : > { %p914_p1 = scmp.ne.s32.totalorder %s1200_s14, %s913_s7  ;;  %s918_s10 = sshll.u32 %s1076_s26, 4  ;;  %s919_s10 = int_to_ptr.vmem [resolvable:$false] %s918_s10 }
  0x2f   : > { %s920_s11 = scalar_lea.vmem %s919_s10, 2048  ;;  %p921_p9 = scmp.lt.s32.totalorder %s1200_s14, %s919_s10 }
  0x30   : > { %p916_p3 = pnand %p914_p1, %p1208_p2  ;;  %p922_p8 = scmp.lt.s32.totalorder %s920_s11, %s913_s7 }
  0x32   : > { %p917_p11 = pneg %p916_p3  ;;  %p923_p5 = por %p922_p8, %p921_p9 }
  0x34   : > { %p924_p6 = pnand %p923_p5, %p917_p11 }
  0x36   : > { %927 = shalt.err (!%p924_p6)
}
  0x37   : > { %s1077_s24 = smov 128   ;;  %s1078_s9 = smov 8  }
  0x38   : > { %829 = dma.hbm_to_vmem [thread:$0]  (!%p1189_p0), %s1198_s12, 1024, %s1200_s14, %s1202_s22, %s1077_s24, %s1077_s24, %s1078_s9  }
  0x39   : > { %p797_p12 = scmp.ge.s32.totalorder %s1074_s20, 1  ;;  %p285_p8 = scmp.lt.s32.totalorder %s1074_s20, 3 }
  0x3a   : > { %s1615_s7 = sshll.u32 %s1181_s5, 3  ;;  %s1243_s11 = scalar_lea.hbm %s1606_s1, %s1184_s6 }
  0x3b   : > { %p1234_p9 = pnand %p797_p12, %p285_p8  ;;  %s220_s2 = scalar_lea.vmem [#allocation2], %s1615_s7 }
  0x3c   : > { %s233_s23 = sshll.u32 %s220_s2, 4  ;;  %s812_s12 = sadd.s32 896, %s1184_s6  ;;  %s1248_s23 = int_to_ptr.vmem [resolvable:$true] %s233_s23 }
  0x3d   : > { %s1629_s13 = scalar_select %p1234_p9, 1, 0 }
  0x3e   : > { %s1253_s9 = scalar_lea.hbm %s1608_s3, %s812_s12  ;;  %s217_s19 = scalar_lea.sflag [#allocation3], %s1181_s5 }
  0x3f   : > { %s928_s29 = scalar_lea.hbm %s1243_s11, 128  ;;  %s933_s17 = scalar_lea.hbm %s1606_s1, 2048 }
  0x40   : > { %p929_p11 = scmp.ne.s32.totalorder %s1243_s11, %s928_s29  ;;  %p934_p10 = scmp.lt.u32.totalorder %s1243_s11, %s1606_s1 }
  0x41   : > { %p935_p13 = scmp.lt.u32.totalorder %s933_s17, %s928_s29  ;;  %p937_p3 = scmp.lt.u32.totalorder %s928_s29, %s1243_s11 }
  0x42   : > { %p931_p4 = pnand %p929_p11, %p1208_p2 }
  0x43   : > { %p936_p1 = por %p935_p13, %p934_p10 }
  0x44   : > { %p932_p7 = pneg %p931_p4 }
  0x45   : > { %p938_p5 = por %p937_p3, %p936_p1 }
  0x47   : > { %p939_p6 = pnand %p938_p5, %p932_p7 }
  0x49   : > { %942 = shalt.err (!%p939_p6)
}
  0x4a   : > { %s943_s6 = scalar_lea.vmem %s1248_s23, 128  ;;  %s1079_s12 = smov [#allocation2]  }
  0x4b   : > { %p944_p12 = scmp.ne.s32.totalorder %s1248_s23, %s943_s6  ;;  %s948_s14 = sshll.u32 %s1079_s12, 4  ;;  %s949_s14 = int_to_ptr.vmem [resolvable:$false] %s948_s14 }
  0x4c   : > { %s950_s7 = scalar_lea.vmem %s949_s14, 256  ;;  %p951_p4 = scmp.lt.s32.totalorder %s1248_s23, %s949_s14 }
  0x4d   : > { %p946_p8 = pnand %p944_p12, %p1208_p2  ;;  %p952_p9 = scmp.lt.s32.totalorder %s950_s7, %s943_s6 }
  0x4f   : > { %p947_p11 = pneg %p946_p8  ;;  %p953_p10 = por %p952_p9, %p951_p4 }
  0x51   : > { %p954_p13 = pnand %p953_p10, %p947_p11 }
  0x53   : > { %957 = shalt.err (!%p954_p13)
}
  0x54   : > { %826 = dma.hbm_to_vmem [thread:$0]  (!%p1189_p0), %s1243_s11, 128, %s1248_s23, %s217_s19  }
  0x55   : > { %s1630_s17 = sshll.u32 %s1181_s5, 3  ;;  %s958_s26 = scalar_lea.hbm %s1253_s9, 128 }
  0x56   : > { %s267_s29 = scalar_lea.vmem [#allocation7], %s1630_s17  ;;  %p959_p7 = scmp.ne.s32.totalorder %s1253_s9, %s958_s26 }
  0x57   : > { %s280_s24 = sshll.u32 %s267_s29, 4  ;;  %s963_s6 = scalar_lea.hbm %s1608_s3, 2048  ;;  %s281_s24 = int_to_ptr.vmem [resolvable:$true] %s280_s24 }
  0x58   : > { %p961_p9 = pnand %p959_p7, %p1208_p2  ;;  %p964_p3 = scmp.lt.u32.totalorder %s1253_s9, %s1608_s3 }
  0x59   : > { %p965_p5 = scmp.lt.u32.totalorder %s963_s6, %s958_s26  ;;  %p967_p12 = scmp.lt.u32.totalorder %s958_s26, %s1253_s9 }
  0x5a   : > { %p962_p1 = pneg %p961_p9 }
  0x5b   : > { %p966_p6 = por %p965_p5, %p964_p3 }
  0x5d   : > { %p968_p8 = por %p967_p12, %p966_p6 }
  0x5f   : > { %p969_p11 = pnand %p968_p8, %p962_p1 }
  0x61   : > { %972 = shalt.err (!%p969_p11)
}
  0x62   : > { %s973_s19 = scalar_lea.vmem %s281_s24, 128  ;;  %s1080_s23 = smov [#allocation7]  }
  0x63   : > { %p974_p4 = scmp.ne.s32.totalorder %s281_s24, %s973_s19  ;;  %s978_s5 = sshll.u32 %s1080_s23, 4  ;;  %s979_s5 = int_to_ptr.vmem [resolvable:$false] %s978_s5 }
  0x64   : > { %s980_s11 = scalar_lea.vmem %s979_s5, 256  ;;  %p981_p7 = scmp.lt.s32.totalorder %s281_s24, %s979_s5 }
  0x65   : > { %p976_p10 = pnand %p974_p4, %p1208_p2  ;;  %p982_p9 = scmp.lt.s32.totalorder %s980_s11, %s973_s19 }
  0x67   : > { %p977_p13 = pneg %p976_p10  ;;  %p983_p0 = por %p982_p9, %p981_p7 }
  0x69   : > { %p984_p3 = pnand %p983_p0, %p977_p13 }
  0x6b   : > { %987 = shalt.err (!%p984_p3)
}
  0x6c   : > { %p1631_p5 = scmp.ne.s32.totalorder %s1626_s8, 0  ;;  %p1632_p1 = scmp.ne.s32.totalorder %s1629_s13, 0 }
  0x6d   : > { %s1300_s25 = sand.u32 (!%p1632_p1), 1, %s1058_s16   ;;  %p1633_p0 = scmp.ne.s32.totalorder (!%p1632_p1), %s1622_s27, 0 }
  0x6e   : > { %832 = dma.hbm_to_vmem [thread:$0]  (!%p1631_p5), %s1253_s9, 128, %s281_s24, %s1202_s22  }
  0x6f   : > { %289 = sbr.rel (%p1632_p1) target bundleno = 320 (0x140), region = 36  ;;  %s798_s7 = sshll.u32 (!%p1632_p1), %s1300_s25, 3 }
  0x70   : > { %s292_s17 = scalar_lea.sflag (!%p1632_p1), [#allocation3], %s1300_s25  ;;  %s295_s29 = scalar_lea.vmem (!%p1632_p1), [#allocation2], %s798_s7 }
  0x76   : > { %1041 = dma.done.wait (%p1633_p0), %s292_s17, 128  }
  0x77   : > { %1043 = vsyncadd (%p1633_p0), %s292_s17, 4294967168  ;;  %s300_s8 = sand.u32 1, %s1143_s21   ;;  %s799_s22 = sshll.u32 %s1300_s25, 6 }
  0x78   : > { %s301_s13 = scalar_lea.sflag [#allocation6], %s300_s8  ;;  %s1314_s9 = scalar_lea.vmem [#allocation5], %s799_s22 }
  0x79   : > { %1045 = dma.done.wait (%p1633_p0), %s301_s13, 1152  }
  0x7a   : > { %1047 = vsyncadd (%p1633_p0), %s301_s13, 4294966144  ;;  %v1081_v0 = vmov 0   ;;  %v400_v1 = vlaneseq  ;;  %v540_v2 = vld [vmem:[%s1605_s0 + $0x10] sm:$0xff]  ;;  %v538_v3 = vld [vmem:[%s1605_s0] sm:$0xff]  ;;  %s313_s14 = scalar_lea.vmem [#allocation7], %s798_s7  ;;  %s1082_s13 = smov 8  }
  0x7b   : > { %895 = vset.pattern.permute.xlu1 %v1081_v0  ;;  %894 = vset.pattern.permute.xlu0 %v1081_v0  ;;  %v541_v5 = vld [vmem:[%s1605_s0 + $0x18] sm:$0xff]  ;;  %v539_v6 = vld [vmem:[%s1605_s0 + $0x8] sm:$0xff]  ;;  %v1339_v8 = vld [vmem:[%s1314_s9 + $0x10] sm:$0xff]  ;;  %s1522_s21 = scalar_lea.vmem [#allocation8], %s799_s22  ;;  %s813_s22 = sshll.u32 %s1066_s18, 10 }
  0x7c   : > { %558 = vperm.xlu1 %895, %v540_v2   ;;  %548 = vperm.xlu0 %894, %v538_v3   ;;  %v1327_v4 = vshrl.u32 %v400_v1, 7  ;;  %v1336_v7 = vld [vmem:[%s1314_s9 + $0x8] sm:$0xff]  ;;  %v1342_v9 = vld [vmem:[%s1314_s9 + $0x18] sm:$0xff]  ;;  %v1345_v10 = vld [vmem:[%s1314_s9] sm:$0xff]  ;;  %s634_s24 = sshll.u32 %s1522_s21, 4  ;;  %s1549_s27 = scalar_lea.hbm %s1609_s4, %s813_s22  ;;  %s1553_s24 = int_to_ptr.vmem [resolvable:$true] %s634_s24 }
  0x7d   : > { %v386_v11 = vadd.f32 %v1339_v8, %v1336_v7  ;;  %v385_v12 = vadd.f32 %v1336_v7, %v1345_v10  ;;  %v1352_v13 = vld [vmem:[%s1314_s9 + $0x20] sm:$0xff]  ;;  %v387_v14 = vadd.f32 %v1342_v9, %v1339_v8  ;;  %v379_v15 = vld [vmem:[%s295_s29] sm:$0xff]  ;;  %v1357_v16 = vld [vmem:[%s1314_s9 + $0x28] sm:$0xff]  ;;  %s619_s18 = scalar_lea.sflag [#allocation4], %s1300_s25  ;;  %s988_s2 = scalar_lea.vmem %s1553_s24, 1024 }
  0x7e   : > { %vm418_vm0 = vcmp.ge.s32.totalorder %v1327_v4, 1  ;;  %v381_v17 = vmul.f32 0.0, %v379_v15  ;;  %v1361_v18 = vld [vmem:[%s1314_s9 + $0x30] sm:$0xff]  ;;  %v389_v19 = vadd.f32 %v1357_v16, %v1352_v13  ;;  %v388_v20 = vadd.f32 %v1352_v13, %v1342_v9  ;;  %v382_v21 = vld [vmem:[%s313_s14] sm:$0xff]  ;;  %v543_v22 = vld [vmem:[%s1605_s0 + $0x28] sm:$0xff]  ;;  %p989_p2 = scmp.ne.s32.totalorder %s1553_s24, %s988_s2  ;;  %p1634_p6 = scmp.ne.s32.totalorder %s1623_s28, 0 }
  0x7f   : > { %v542_v23 = vld [vmem:[%s1605_s0 + $0x20] sm:$0xff]  ;;  %v394_v24 = vadd.f32 %v386_v11, %v1342_v9  ;;  %vm437_vm1 = vcmp.lt.s32.totalorder %v1327_v4, 7  ;;  %v393_v25 = vadd.f32 %v385_v12, %v1339_v8  ;;  %v395_v26 = vadd.f32 %v387_v14, %v1352_v13  ;;  %v1383_v35 = vld [vmem:[%s1314_s9 + $0x38] sm:$0xff]  ;;  %v545_v40 = vld [vmem:[%s1605_s0 + $0x38] sm:$0xff]  ;;  %s1083_s9 = smov 120   ;;  %s1085_s6 = smov [#allocation8]  }
  0x80   : > { %563 = vperm.xlu1 %895, %v541_v5   ;;  %553 = vperm.xlu0 %894, %v539_v6   ;;  %v384_v27 = vadd.f32 %v381_v17, %v1345_v10  ;;  %v397_v28 = vadd.f32 %v389_v19, %v1361_v18  ;;  %v396_v29 = vadd.f32 %v388_v20, %v1357_v16  ;;  %v383_v30 = vmul.f32 0.0, %v382_v21  ;;  %v544_v41 = vld [vmem:[%s1605_s0 + $0x30] sm:$0xff]  ;;  %p990_p12 = pnand %p989_p2, %p1634_p6  ;;  %s992_s12 = sshll.u32 %s1085_s6, 4  ;;  %s993_s12 = int_to_ptr.vmem [resolvable:$false] %s992_s12 }
  0x81   : > { %v404_v31 = vrot.slane %v394_v24, 7  ;;  %v412_v32 = vrot.slane %v394_v24, 1  ;;  %v403_v33 = vrot.slane %v393_v25, 7  ;;  %v411_v34 = vrot.slane %v393_v25, 1  ;;  %s994_s14 = scalar_lea.vmem %s993_s12, 2048  ;;  %p995_p11 = scmp.lt.s32.totalorder %s1553_s24, %s993_s12 }
  0x82   : > { %v405_v36 = vrot.slane %v395_v26, 7  ;;  %v413_v37 = vrot.slane %v395_v26, 1  ;;  %v392_v38 = vadd.f32 %v384_v27, %v1336_v7  ;;  %v407_v39 = vrot.slane %v397_v28, 7  ;;  %p991_p8 = pneg %p990_p12  ;;  %p996_p4 = scmp.lt.s32.totalorder %s994_s14, %s988_s2 }
  0x83   : > { %v423_v42 = vsel %vm418_vm0, %v404_v31, 0.0  ;;  %v442_v43 = vsel %vm437_vm1, %v412_v32, 0.0  ;;  %v422_v44 = vsel %vm418_vm0, %v403_v33, 0.0  ;;  %v441_v45 = vsel %vm437_vm1, %v411_v34, 0.0 }
  0x84   : > { %573 = vperm.xlu1 %895, %v543_v22   ;;  %568 = vperm.xlu0 %894, %v542_v23   ;;  %v431_v46 = vadd.f32 %v423_v42, %v394_v24  ;;  %v430_v47 = vadd.f32 %v422_v44, %v393_v25  ;;  %v424_v48 = vsel %vm418_vm0, %v405_v36, 0.0  ;;  %v391_v49 = vadd.f32 %v1383_v35, %v1361_v18  ;;  %p997_p10 = por %p996_p4, %p995_p11 }
  0x85   : > { %v432_v50 = vadd.f32 %v424_v48, %v395_v26  ;;  %v443_v51 = vsel %vm437_vm1, %v413_v37, 0.0  ;;  %v402_v52 = vrot.slane %v392_v38, 7  ;;  %v410_v53 = vrot.slane %v392_v38, 1 }
  0x86   : > { %v1406_v54 = vadd.f32 %v442_v43, %v431_v46  ;;  %v1408_v55 = vadd.f32 %v441_v45, %v430_v47  ;;  %v415_v56 = vrot.slane %v397_v28, 1  ;;  %v406_v57 = vrot.slane %v396_v29, 7  ;;  %p998_p13 = pnand %p997_p10, %p991_p8 }
  0x87   : > { %v421_v58 = vsel %vm418_vm0, %v402_v52, 0.0  ;;  %v440_v59 = vsel %vm437_vm1, %v410_v53, 0.0  ;;  %v426_v60 = vsel %vm418_vm0, %v407_v39, 0.0  ;;  %v414_v62 = vrot.slane %v396_v29, 1 }
  0x88   : > { %583 = vperm.xlu1 %895, %v545_v40   ;;  %578 = vperm.xlu0 %894, %v544_v41   ;;  %v429_v61 = vadd.f32 %v421_v58, %v392_v38  ;;  %v425_v63 = vsel %vm418_vm0, %v406_v57, 0.0  ;;  %v1418_v0 = vadd.f32 %v443_v51, %v432_v50  ;;  %v399_v2 = vadd.f32 %v391_v49, %v383_v30 }
  0x89   : > { %v390_v3 = vadd.f32 %v1361_v18, %v1357_v16  ;;  %v434_v6 = vadd.f32 %v426_v60, %v397_v28  ;;  %v445_v11 = vsel %vm437_vm1, %v415_v56, 0.0  ;;  %v433_v12 = vadd.f32 %v425_v63, %v396_v29 }
  0x8a   : > { %v1426_v5 = vadd.f32 %v440_v59, %v429_v61  ;;  %v444_v14 = vsel %vm437_vm1, %v414_v62, 0.0  ;;  %v409_v15 = vrot.slane %v399_v2, 7  ;;  %v417_v17 = vrot.slane %v399_v2, 1 }
  0x8b   : > { %v398_v19 = vadd.f32 %v390_v3, %v1383_v35  ;;  %v1439_v23 = vadd.f32 %v445_v11, %v434_v6  ;;  %v1441_v24 = vadd.f32 %v444_v14, %v433_v12  ;;  %v1474_v38 = vand.u32 127, %v400_v1 }
  0x8c   : > { %462 = vrot.lane.b32.xlu0 %v1406_v54, %s1082_s13  ;;  %460 = vrot.lane.b32.xlu1 %v1408_v55, %s1082_s13  ;;  %v428_v20 = vsel %vm418_vm0, %v409_v15, 0.0  ;;  %v447_v26 = vsel %vm437_vm1, %v417_v17, 0.0  ;;  %v1084_v41 = vmov 0.0  }
  0x8d   : > { %v408_v21 = vrot.slane %v398_v19, 7  ;;  %v416_v22 = vrot.slane %v398_v19, 1  ;;  %v436_v25 = vadd.f32 %v428_v20, %v399_v2  ;;  %vm528_vm2 = vcmp.lt.s32.totalorder %v1474_v38, 8 }
  0x8e   : > { %v802_v42 = vsel %vm528_vm2, 1.0, %v1084_v41  ;;  %vm532_vm3 = vcmp.ge.s32.totalorder %v1474_v38, 120  ;;  %vm490_vm4 = vcmp.ge.s32.totalorder %v1474_v38, 8  ;;  %vm509_vm5 = vcmp.lt.s32.totalorder %v1474_v38, 120 }
  0x8f   : > { %v427_v27 = vsel %vm418_vm0, %v408_v21, 0.0  ;;  %v446_v28 = vsel %vm437_vm1, %v416_v22, 0.0  ;;  %v1453_v30 = vadd.f32 %v447_v26, %v436_v25  ;;  %v531_v45 = vsub.f32 3.0, %v802_v42 }
  0x90   : > { %464 = vrot.lane.b32.xlu1 %v1418_v0, %s1082_s13  ;;  %458 = vrot.lane.b32.xlu0 %v1426_v5, %s1082_s13  ;;  %v435_v29 = vadd.f32 %v427_v27, %v398_v19  ;;  %v803_v46 = vsel %vm532_vm3, 1.0, %v1084_v41 }
  0x91   : > { %v535_v49 = vsub.f32 %v531_v45, %v803_v46 }
  0x92   : > { %v1455_v31 = vadd.f32 %v446_v28, %v435_v29 }
  0x93   : > { %896 = vrcp.f32 %v535_v49 }
  0x94   : > { %468 = vrot.lane.b32.xlu1 %v1439_v23, %s1082_s13  ;;  %466 = vrot.lane.b32.xlu0 %v1441_v24, %s1082_s13 }
  0x98   : > { %472 = vrot.lane.b32.xlu1 %v1453_v30, %s1082_s13  ;;  %470 = vrot.lane.b32.xlu0 %v1455_v31, %s1082_s13 }
  0x9c   : > { %476 = vrot.lane.b32.xlu1 %v1408_v55, %s1083_s9  ;;  %474 = vrot.lane.b32.xlu0 %v1426_v5, %s1083_s9 }
  0x9d   : > { %v897_v11 = vpop.eup %896 }
  0xa0   : > { %480 = vrot.lane.b32.xlu1 %v1418_v0, %s1083_s9  ;;  %478 = vrot.lane.b32.xlu0 %v1406_v54, %s1083_s9 }
  0xa4   : > { %484 = vrot.lane.b32.xlu1 %v1439_v23, %s1083_s9  ;;  %482 = vrot.lane.b32.xlu0 %v1441_v24, %s1083_s9 }
  0xa8   : > { %488 = vrot.lane.b32.xlu1 %v1453_v30, %s1083_s9  ;;  %486 = vrot.lane.b32.xlu0 %v1455_v31, %s1083_s9 }
  0xfb   : > { %v559_v4 = vpop.permute.xlu1 %558  ;;  %v549_v32 = vpop.permute.xlu0 %548 }
  0xff   : > { %v564_v33 = vpop.permute.xlu1 %563  ;;  %v554_v34 = vpop.permute.xlu0 %553 }
 0x103   : > { %v1469_v36 = vpop.permute.xlu1 %573  ;;  %v1471_v37 = vpop.permute.xlu0 %568 }
 0x107   : > { %v1477_v39 = vpop.permute.xlu1 %583  ;;  %v1479_v40 = vpop.permute.xlu0 %578 }
 0x10b   : > { %v463_v43 = vpop.permute.xlu0 %462  ;;  %v461_v44 = vpop.permute.xlu1 %460 }
 0x10c   : > { %v494_v53 = vsel %vm490_vm4, %v461_v44, 0.0  ;;  %v495_v57 = vsel %vm490_vm4, %v463_v43, 0.0 }
 0x10d   : > { %v502_v58 = vadd.f32 %v494_v53, %v1408_v55  ;;  %v503_v12 = vadd.f32 %v495_v57, %v1406_v54 }
 0x10f   : > { %v465_v47 = vpop.permute.xlu1 %464  ;;  %v459_v48 = vpop.permute.xlu0 %458 }
 0x110   : > { %v493_v56 = vsel %vm490_vm4, %v459_v48, 0.0  ;;  %v496_v59 = vsel %vm490_vm4, %v465_v47, 0.0 }
 0x111   : > { %v501_v60 = vadd.f32 %v493_v56, %v1426_v5  ;;  %v504_v55 = vadd.f32 %v496_v59, %v1418_v0 }
 0x113   : > { %v469_v50 = vpop.permute.xlu1 %468  ;;  %v467_v1 = vpop.permute.xlu0 %466 }
 0x114   : > { %v498_v14 = vsel %vm490_vm4, %v469_v50, 0.0  ;;  %v497_v5 = vsel %vm490_vm4, %v467_v1, 0.0 }
 0x115   : > { %v506_v27 = vadd.f32 %v498_v14, %v1439_v23  ;;  %v505_v28 = vadd.f32 %v497_v5, %v1441_v24 }
 0x117   : > { %v473_v51 = vpop.permute.xlu1 %472  ;;  %v471_v52 = vpop.permute.xlu0 %470 }
 0x118   : > { %v500_v29 = vsel %vm490_vm4, %v473_v51, 0.0 }
 0x11b   : > { %v477_v61 = vpop.permute.xlu1 %476  ;;  %v475_v62 = vpop.permute.xlu0 %474 }
 0x11c   : > { %v513_v63 = vsel %vm509_vm5, %v477_v61, 0.0  ;;  %v512_v2 = vsel %vm509_vm5, %v475_v62, 0.0 }
 0x11d   : > { %v521_v3 = vadd.f32 %v513_v63, %v502_v58  ;;  %v520_v6 = vadd.f32 %v512_v2, %v501_v60 }
 0x11f   : > { %v587_v15 = vmul.f32 %v554_v34, %v521_v3  ;;  %v586_v17 = vmul.f32 %v549_v32, %v520_v6  ;;  %v481_v19 = vpop.permute.xlu1 %480  ;;  %v479_v20 = vpop.permute.xlu0 %478  ;;  %v499_v32 = vsel %vm490_vm4, %v471_v52, 0.0 }
 0x120   : > { %v515_v21 = vsel %vm509_vm5, %v481_v19, 0.0  ;;  %v514_v22 = vsel %vm509_vm5, %v479_v20, 0.0  ;;  %v507_v47 = vadd.f32 %v499_v32, %v1455_v31 }
 0x121   : > { %v595_v25 = vmul.f32 %v897_v11, %v587_v15  ;;  %v594_v54 = vmul.f32 %v897_v11, %v586_v17  ;;  %v523_v0 = vadd.f32 %v515_v21, %v504_v55  ;;  %v522_v26 = vadd.f32 %v514_v22, %v503_v12 }
 0x123   : > { %v603_v34 = vsub.f32 %v595_v25, %v1336_v7  ;;  %v602_v41 = vsub.f32 %v594_v54, %v1345_v10  ;;  %v589_v42 = vmul.f32 %v564_v33, %v523_v0  ;;  %v588_v43 = vmul.f32 %v559_v4, %v522_v26  ;;  %v485_v44 = vpop.permute.xlu1 %484  ;;  %v483_v45 = vpop.permute.xlu0 %482 }
 0x124   : > { %v517_v46 = vsel %vm509_vm5, %v485_v44, 0.0  ;;  %v516_v23 = vsel %vm509_vm5, %v483_v45, 0.0  ;;  %v508_v33 = vadd.f32 %v500_v29, %v1453_v30 }
 0x125   : > { %611 = vst [vmem:[%s1522_s21 + $0x8] sm:$0xff] %v603_v34  ;;  %610 = vst [vmem:[%s1522_s21] sm:$0xff] %v602_v41  ;;  %v597_v7 = vmul.f32 %v897_v11, %v589_v42  ;;  %v596_v10 = vmul.f32 %v897_v11, %v588_v43  ;;  %v525_v24 = vadd.f32 %v517_v46, %v506_v27 }
 0x126   : > { %v524_v4 = vadd.f32 %v516_v23, %v505_v28 }
 0x127   : > { %v605_v48 = vsub.f32 %v597_v7, %v1342_v9  ;;  %v604_v49 = vsub.f32 %v596_v10, %v1339_v8  ;;  %v591_v50 = vmul.f32 %v1469_v36, %v525_v24  ;;  %v489_v51 = vpop.permute.xlu1 %488  ;;  %v487_v52 = vpop.permute.xlu0 %486 }
 0x128   : > { %v590_v1 = vmul.f32 %v1471_v37, %v524_v4  ;;  %v519_v53 = vsel %vm509_vm5, %v489_v51, 0.0  ;;  %v518_v30 = vsel %vm509_vm5, %v487_v52, 0.0 }
 0x129   : > { %613 = vst [vmem:[%s1522_s21 + $0x18] sm:$0xff] %v605_v48  ;;  %612 = vst [vmem:[%s1522_s21 + $0x10] sm:$0xff] %v604_v49  ;;  %v599_v9 = vmul.f32 %v897_v11, %v591_v50  ;;  %v527_v31 = vadd.f32 %v519_v53, %v508_v33  ;;  %v526_v36 = vadd.f32 %v518_v30, %v507_v47 }
 0x12a   : > { %v598_v8 = vmul.f32 %v897_v11, %v590_v1 }
 0x12b   : > { %v607_v37 = vsub.f32 %v599_v9, %v1357_v16  ;;  %v593_v57 = vmul.f32 %v1477_v39, %v527_v31  ;;  %v592_v58 = vmul.f32 %v1479_v40, %v526_v36 }
 0x12c   : > { %v606_v56 = vsub.f32 %v598_v8, %v1352_v13 }
 0x12d   : > { %615 = vst [vmem:[%s1522_s21 + $0x28] sm:$0xff] %v607_v37  ;;  %v601_v38 = vmul.f32 %v897_v11, %v593_v57  ;;  %v600_v59 = vmul.f32 %v897_v11, %v592_v58 }
 0x12e   : > { %614 = vst [vmem:[%s1522_s21 + $0x20] sm:$0xff] %v606_v56 }
 0x12f   : > { %v609_v16 = vsub.f32 %v601_v38, %v1383_v35  ;;  %v608_v13 = vsub.f32 %v600_v59, %v1361_v18 }
 0x131   : > { %617 = vst [vmem:[%s1522_s21 + $0x38] sm:$0xff] %v609_v16  ;;  %616 = vst [vmem:[%s1522_s21 + $0x30] sm:$0xff] %v608_v13 }
 0x132   : > { %1001 = shalt.err (!%p998_p13)
}
 0x133   : > { %s1002_s19 = scalar_lea.hbm %s1549_s27, 1024  ;;  %s1006_s11 = scalar_lea.hbm %s1609_s4, 2048 }
 0x134   : > { %p1003_p7 = scmp.ne.s32.totalorder %s1549_s27, %s1002_s19  ;;  %p1007_p5 = scmp.lt.u32.totalorder %s1549_s27, %s1609_s4 }
 0x135   : > { %p1008_p1 = scmp.lt.u32.totalorder %s1006_s11, %s1002_s19  ;;  %p1010_p2 = scmp.lt.u32.totalorder %s1002_s19, %s1549_s27 }
 0x136   : > { %p1004_p9 = pnand %p1003_p7, %p1634_p6 }
 0x137   : > { %p1009_p0 = por %p1008_p1, %p1007_p5 }
 0x138   : > { %p1005_p3 = pneg %p1004_p9 }
 0x139   : > { %p1011_p12 = por %p1010_p2, %p1009_p0 }
 0x13b   : > { %p1012_p8 = pnand %p1011_p12, %p1005_p3 }
 0x13d   : > { %1015 = shalt.err (!%p1012_p8)
}
 0x13e   : > { %s1086_s29 = smov 128  }
 0x13f   : > { %821 = dma.vmem_to_hbm [thread:$0]  (%p1634_p6), %s1553_s24, 1024, %s1549_s27, %s619_s18, %s1086_s29, %s1086_s29, %s1082_s13  }
 0x140 PF: > { %s649_s8 = sand.u32 1, %s1054_s15   ;;  %p1635_p11 = scmp.ne.s32.totalorder %s1625_s30, 0 }
 0x141   : > { %p1636_p4 = scmp.ge.s32.totalorder %s1074_s20, 2  ;;  %s650_s9 = scalar_lea.sflag [#allocation4], %s649_s8 }
 0x143   : > { %p834_p10 = pnand %p1636_p4, %p1635_p11 }
 0x145   : > { %1049 = dma.done.wait (!%p834_p10), %s650_s9, 1024  }
 0x146   : > { %1051 = vsyncadd (!%p834_p10), %s650_s9, 4294966272  ;;  %s23_s20 = sadd.s32 1, %s1074_s20   ;;  %s1637_s28 = sld [smem:[#allocation12_spill]] }
 0x147   : > { %p20_p13 = scmp.ge.s32.totalorder %s23_s20, 4   ;;  %s1638_s17 = sld [smem:[#allocation15_spill]] }
 0x148   : > { %s1639_s18 = sld [smem:[#allocation13_spill]]  ;;  %s1640_s19 = sld [smem:[#allocation14_spill]] }
 0x149   : > { %s1641_s15 = smov %s1058_s16  ;;  %22 = sbr.rel (!%p20_p13) target bundleno = 10 (0xa), region = 108 }
 0x14c   : > { %s1642_s16 = smov %s1637_s28 }
 0x150   :  { %655 = vsyncpa [#allocation3], 1 }
 0x151   :  { %657 = vsyncpa [#allocation3 + $0x1], 1 }
 0x152   :  { %658 = vsyncpa [#allocation6], 1 }
 0x153   :  { %660 = vsyncpa [#allocation6 + $0x1], 1 }
 0x154   :  { %661 = vsyncpa [#allocation4], 1 }
 0x155   :  { %663 = vsyncpa [#allocation4 + $0x1], 1 }

</bundles_post_ra>
